<compile_context>
chip_gen: v7x
topology: tpu7x:2x2x1
jax: 0.10.0
libtpu: 0.0.40
codegen_flags: <defaults>
</compile_context>

<pallas_src>
import functools

import jax
import jax.numpy as jnp
from jax.experimental import pallas as pl
from jax.experimental.pallas import tpu as pltpu

IN_DIM, H_DIM, OUT_DIM = 5, 20, 7
OUT_PAD = 8  # pad 7 -> 8 so the output block's last dim equals the full array dim


def _round_up(x, m):
    return (x + m - 1) // m * m


def mlp_kernel(x_ref,
               w1_ref, b1_ref,
               w2_ref, b2_ref,
               w3_ref, b3_ref,
               w4_ref, b4_ref,
               o_ref):
    # fc1 + relu (f32 operands, f32 MXU accumulation)
    h = jnp.dot(x_ref[...], w1_ref[...], preferred_element_type=jnp.float32)
    h = jnp.maximum(h + b1_ref[...], 0.0)
    # fc2 + relu
    h = jnp.dot(h, w2_ref[...], preferred_element_type=jnp.float32)
    h = jnp.maximum(h + b2_ref[...], 0.0)
    # fc3 + relu
    h = jnp.dot(h, w3_ref[...], preferred_element_type=jnp.float32)
    h = jnp.maximum(h + b3_ref[...], 0.0)
    # fc4 (no activation); output feature dim padded 7 -> 8
    h = jnp.dot(h, w4_ref[...], preferred_element_type=jnp.float32)
    o_ref[...] = (h + b4_ref[...]).astype(o_ref.dtype)


def prepare_params(params):
    """One-time parameter prep: zero-pad fc4 from 7 to 8 output columns.

    params: list of (W, b) with W: (in, out) float32, b: (1, out) float32.
    Returns a flat tuple of kernel arguments (all float32).
    """
    (w1, b1), (w2, b2), (w3, b3), (w4, b4) = params
    w4p = jnp.pad(w4, ((0, 0), (0, OUT_PAD - w4.shape[1])))
    b4p = jnp.pad(b4, ((0, 0), (0, OUT_PAD - b4.shape[1])))
    return (w1.astype(jnp.float32), b1.astype(jnp.float32),
            w2.astype(jnp.float32), b2.astype(jnp.float32),
            w3.astype(jnp.float32), b3.astype(jnp.float32),
            w4p.astype(jnp.float32), b4p.astype(jnp.float32))


def _choose_tile_b(batch, tile_b):
    tile_b = _round_up(max(8, tile_b), 8)
    # Ensure >= 2 grid steps (when the batch allows it) so the "parallel" axis
    # can be sharded across both TensorCores on v7x.
    if batch > 8:
        tile_b = min(tile_b, _round_up(pl.cdiv(batch, 2), 8))
    return tile_b


@functools.partial(jax.jit, static_argnames=("tile_b",))
def net_forward(x, prepared_params, *, tile_b=1024):
    """x: (B, 5) float32; prepared_params: output of prepare_params()."""
    B = x.shape[0]
    tile_b = _choose_tile_b(B, tile_b)
    grid = (pl.cdiv(B, tile_b),)  # ragged last block is clipped/masked by Pallas

    in_specs = [pl.BlockSpec((tile_b, IN_DIM), lambda i: (i, 0))]
    # Full-extent, grid-invariant parameter blocks: fetched once, VMEM-resident.
    in_specs += [pl.BlockSpec(a.shape, lambda i: (0, 0)) for a in prepared_params]

    flops_per_row = 2 * (IN_DIM * H_DIM + 2 * H_DIM * H_DIM + H_DIM * OUT_PAD)
    param_bytes = sum(a.size * a.dtype.itemsize for a in prepared_params)
    cost = pl.CostEstimate(
        flops=B * flops_per_row,
        transcendentals=0,
        bytes_accessed=B * (IN_DIM + OUT_PAD) * 4 + param_bytes,
    )

    out = pl.pallas_call(
        mlp_kernel,
        out_shape=jax.ShapeDtypeStruct((B, OUT_PAD), jnp.float32),
        grid=grid,
        in_specs=in_specs,
        out_specs=pl.BlockSpec((tile_b, OUT_PAD), lambda i: (i, 0)),
        compiler_params=pltpu.CompilerParams(
            dimension_semantics=("parallel",)),
        cost_estimate=cost,
    )(x, *prepared_params)

    # Only the trivial column trim remains (8th column is exactly zero anyway).
    return out[:, :OUT_DIM]


def init_params(key):
    """Deterministic init mimicking PyTorch Linear's U(-1/sqrt(fan_in), 1/sqrt(fan_in))."""
    sizes = [(IN_DIM, H_DIM), (H_DIM, H_DIM), (H_DIM, H_DIM), (H_DIM, OUT_DIM)]
    params = []
    for fan_in, fan_out in sizes:
        key, kw, kb = jax.random.split(key, 3)
        bound = 1.0 / jnp.sqrt(fan_in)
        w = jax.random.uniform(kw, (fan_in, fan_out), jnp.float32, -bound, bound)
        b = jax.random.uniform(kb, (1, fan_out), jnp.float32, -bound, bound)
        params.append((w, b))
    return params


def reference_forward(x, params):
    """Pure-JAX f32 reference matching the PyTorch module's forward."""
    h = x
    for i, (w, b) in enumerate(params):
        h = jnp.dot(h, w, preferred_element_type=jnp.float32) + b
        if i < len(params) - 1:
            h = jnp.maximum(h, 0.0)
    return h


if __name__ == "__main__":
    key = jax.random.PRNGKey(0)
    kx, kp = jax.random.split(key)
    params = init_params(kp)
    prepared = prepare_params(params)

    # Small batch; the tile clamp gives tile_b=24 -> a 2-step grid with a
    # ragged (clipped) last block, exercising the masked-store path.
    batch = 40
    x = jax.random.normal(kx, (batch, IN_DIM), jnp.float32)

    out = jax.block_until_ready(net_forward(x, prepared, tile_b=1024))
    assert out.shape == (batch, OUT_DIM), out.shape

    ref = reference_forward(x, params)
    max_err = float(jnp.max(jnp.abs(out - ref)))
    assert jnp.allclose(out, ref, atol=2e-3, rtol=2e-3), max_err

    # TODO(synk): gen_diagram (Graphviz dot-file emission) is host-side I/O with
    # no numeric computation, so it has no Pallas equivalent and is omitted.
    print("KERNEL_OK")
</pallas_src>

<mosaic_0001>
module attributes {stable_mosaic.version = 11 : i64} {
  func.func @mlp_kernel(%arg0: i32, %arg1: memref<24x5xf32, #tpu.memory_space<vmem>>, %arg2: memref<5x20xf32, #tpu.memory_space<vmem>>, %arg3: memref<1x20xf32, #tpu.memory_space<vmem>>, %arg4: memref<20x20xf32, #tpu.memory_space<vmem>>, %arg5: memref<1x20xf32, #tpu.memory_space<vmem>>, %arg6: memref<20x20xf32, #tpu.memory_space<vmem>>, %arg7: memref<1x20xf32, #tpu.memory_space<vmem>>, %arg8: memref<20x8xf32, #tpu.memory_space<vmem>>, %arg9: memref<1x8xf32, #tpu.memory_space<vmem>>, %arg10: memref<24x8xf32, #tpu.memory_space<vmem>>) attributes {dimension_semantics = [#tpu.dimension_semantics<parallel>], iteration_bounds = array<i64: 2>, scalar_prefetch = 0 : i64, scratch_operands = 0 : i64, tpu.core_type = #tpu.core_type<tc>, window_params = [{transform_indices = @transform_0, window_bounds = array<i64: 24, 5>}, {pipeline_mode = #tpu.pipeline_mode<synchronous>, transform_indices = @transform_1, window_bounds = array<i64: 5, 20>}, {pipeline_mode = #tpu.pipeline_mode<synchronous>, transform_indices = @transform_2, window_bounds = array<i64: 1, 20>}, {pipeline_mode = #tpu.pipeline_mode<synchronous>, transform_indices = @transform_3, window_bounds = array<i64: 20, 20>}, {pipeline_mode = #tpu.pipeline_mode<synchronous>, transform_indices = @transform_4, window_bounds = array<i64: 1, 20>}, {pipeline_mode = #tpu.pipeline_mode<synchronous>, transform_indices = @transform_5, window_bounds = array<i64: 20, 20>}, {pipeline_mode = #tpu.pipeline_mode<synchronous>, transform_indices = @transform_6, window_bounds = array<i64: 1, 20>}, {pipeline_mode = #tpu.pipeline_mode<synchronous>, transform_indices = @transform_7, window_bounds = array<i64: 20, 8>}, {pipeline_mode = #tpu.pipeline_mode<synchronous>, transform_indices = @transform_8, window_bounds = array<i64: 1, 8>}, {transform_indices = @transform_9, window_bounds = array<i64: 24, 8>}]} {
    %c0 = arith.constant 0 : index
    %c0_0 = arith.constant 0 : index
    %0 = vector.load %arg1[%c0, %c0_0] : memref<24x5xf32, #tpu.memory_space<vmem>>, vector<24x5xf32>
    %c0_1 = arith.constant 0 : index
    %c0_2 = arith.constant 0 : index
    %1 = vector.load %arg2[%c0_1, %c0_2] : memref<5x20xf32, #tpu.memory_space<vmem>>, vector<5x20xf32>
    %cst = arith.constant dense<0.000000e+00> : vector<24x20xf32>
    %2 = tpu.matmul %0, %1, %cst {dimension_numbers = #tpu.dot_dimension_numbers<[1], [0], [0], [1], [0, 0, 1, 1], [], []>} : vector<24x5xf32>, vector<5x20xf32>, vector<24x20xf32> -> vector<24x20xf32>
    %c0_3 = arith.constant 0 : index
    %c0_4 = arith.constant 0 : index
    %3 = vector.load %arg3[%c0_3, %c0_4] : memref<1x20xf32, #tpu.memory_space<vmem>>, vector<1x20xf32>
    %4 = vector.broadcast %3 : vector<1x20xf32> to vector<24x20xf32>
    %5 = arith.addf %2, %4 : vector<24x20xf32>
    %cst_5 = arith.constant 0.000000e+00 : f32
    %6 = vector.broadcast %cst_5 : f32 to vector<24x20xf32>
    %7 = arith.maximumf %5, %6 : vector<24x20xf32>
    %c0_6 = arith.constant 0 : index
    %c0_7 = arith.constant 0 : index
    %8 = vector.load %arg4[%c0_6, %c0_7] : memref<20x20xf32, #tpu.memory_space<vmem>>, vector<20x20xf32>
    %cst_8 = arith.constant dense<0.000000e+00> : vector<24x20xf32>
    %9 = tpu.matmul %7, %8, %cst_8 {dimension_numbers = #tpu.dot_dimension_numbers<[1], [0], [0], [1], [0, 0, 1, 1], [], []>} : vector<24x20xf32>, vector<20x20xf32>, vector<24x20xf32> -> vector<24x20xf32>
    %c0_9 = arith.constant 0 : index
    %c0_10 = arith.constant 0 : index
    %10 = vector.load %arg5[%c0_9, %c0_10] : memref<1x20xf32, #tpu.memory_space<vmem>>, vector<1x20xf32>
    %11 = vector.broadcast %10 : vector<1x20xf32> to vector<24x20xf32>
    %12 = arith.addf %9, %11 : vector<24x20xf32>
    %cst_11 = arith.constant 0.000000e+00 : f32
    %13 = vector.broadcast %cst_11 : f32 to vector<24x20xf32>
    %14 = arith.maximumf %12, %13 : vector<24x20xf32>
    %c0_12 = arith.constant 0 : index
    %c0_13 = arith.constant 0 : index
    %15 = vector.load %arg6[%c0_12, %c0_13] : memref<20x20xf32, #tpu.memory_space<vmem>>, vector<20x20xf32>
    %cst_14 = arith.constant dense<0.000000e+00> : vector<24x20xf32>
    %16 = tpu.matmul %14, %15, %cst_14 {dimension_numbers = #tpu.dot_dimension_numbers<[1], [0], [0], [1], [0, 0, 1, 1], [], []>} : vector<24x20xf32>, vector<20x20xf32>, vector<24x20xf32> -> vector<24x20xf32>
    %c0_15 = arith.constant 0 : index
    %c0_16 = arith.constant 0 : index
    %17 = vector.load %arg7[%c0_15, %c0_16] : memref<1x20xf32, #tpu.memory_space<vmem>>, vector<1x20xf32>
    %18 = vector.broadcast %17 : vector<1x20xf32> to vector<24x20xf32>
    %19 = arith.addf %16, %18 : vector<24x20xf32>
    %cst_17 = arith.constant 0.000000e+00 : f32
    %20 = vector.broadcast %cst_17 : f32 to vector<24x20xf32>
    %21 = arith.maximumf %19, %20 : vector<24x20xf32>
    %c0_18 = arith.constant 0 : index
    %c0_19 = arith.constant 0 : index
    %22 = vector.load %arg8[%c0_18, %c0_19] : memref<20x8xf32, #tpu.memory_space<vmem>>, vector<20x8xf32>
    %cst_20 = arith.constant dense<0.000000e+00> : vector<24x8xf32>
    %23 = tpu.matmul %21, %22, %cst_20 {dimension_numbers = #tpu.dot_dimension_numbers<[1], [0], [0], [1], [0, 0, 1, 1], [], []>} : vector<24x20xf32>, vector<20x8xf32>, vector<24x8xf32> -> vector<24x8xf32>
    %c0_21 = arith.constant 0 : index
    %c0_22 = arith.constant 0 : index
    %24 = vector.load %arg9[%c0_21, %c0_22] : memref<1x8xf32, #tpu.memory_space<vmem>>, vector<1x8xf32>
    %25 = vector.broadcast %24 : vector<1x8xf32> to vector<24x8xf32>
    %26 = arith.addf %23, %25 : vector<24x8xf32>
    %c0_23 = arith.constant 0 : index
    %c0_24 = arith.constant 0 : index
    %27 = vector.load %arg10[%c0_23, %c0_24] : memref<24x8xf32, #tpu.memory_space<vmem>>, vector<24x8xf32>
    tpu.vector_store %arg10[%c0_23, %c0_24], %26 {strides = array<i32>} : memref<24x8xf32, #tpu.memory_space<vmem>>, vector<24x8xf32>,
    return
  }
  func.func @transform_0(%arg0: i32) -> (i32, i32) {
    %c0_i32 = arith.constant 0 : i32
    %c0_i32_0 = arith.constant 0 : i32
    return %arg0, %c0_i32 : i32, i32
  }
  func.func @transform_1(%arg0: i32) -> (i32, i32) {
    %c0_i32 = arith.constant 0 : i32
    %c0_i32_0 = arith.constant 0 : i32
    %c0_i32_1 = arith.constant 0 : i32
    return %c0_i32, %c0_i32_0 : i32, i32
  }
  func.func @transform_2(%arg0: i32) -> (i32, i32) {
    %c0_i32 = arith.constant 0 : i32
    %c0_i32_0 = arith.constant 0 : i32
    %c0_i32_1 = arith.constant 0 : i32
    return %c0_i32, %c0_i32_0 : i32, i32
  }
  func.func @transform_3(%arg0: i32) -> (i32, i32) {
    %c0_i32 = arith.constant 0 : i32
    %c0_i32_0 = arith.constant 0 : i32
    %c0_i32_1 = arith.constant 0 : i32
    return %c0_i32, %c0_i32_0 : i32, i32
  }
  func.func @transform_4(%arg0: i32) -> (i32, i32) {
    %c0_i32 = arith.constant 0 : i32
    %c0_i32_0 = arith.constant 0 : i32
    %c0_i32_1 = arith.constant 0 : i32
    return %c0_i32, %c0_i32_0 : i32, i32
  }
  func.func @transform_5(%arg0: i32) -> (i32, i32) {
    %c0_i32 = arith.constant 0 : i32
    %c0_i32_0 = arith.constant 0 : i32
    %c0_i32_1 = arith.constant 0 : i32
    return %c0_i32, %c0_i32_0 : i32, i32
  }
  func.func @transform_6(%arg0: i32) -> (i32, i32) {
    %c0_i32 = arith.constant 0 : i32
    %c0_i32_0 = arith.constant 0 : i32
    %c0_i32_1 = arith.constant 0 : i32
    return %c0_i32, %c0_i32_0 : i32, i32
  }
  func.func @transform_7(%arg0: i32) -> (i32, i32) {
    %c0_i32 = arith.constant 0 : i32
    %c0_i32_0 = arith.constant 0 : i32
    %c0_i32_1 = arith.constant 0 : i32
    return %c0_i32, %c0_i32_0 : i32, i32
  }
  func.func @transform_8(%arg0: i32) -> (i32, i32) {
    %c0_i32 = arith.constant 0 : i32
    %c0_i32_0 = arith.constant 0 : i32
    %c0_i32_1 = arith.constant 0 : i32
    return %c0_i32, %c0_i32_0 : i32, i32
  }
  func.func @transform_9(%arg0: i32) -> (i32, i32) {
    %c0_i32 = arith.constant 0 : i32
    %c0_i32_0 = arith.constant 0 : i32
    return %arg0, %c0_i32 : i32, i32
  }
}

</mosaic_0001>

<bundles_post_ra>
// kernel: net_forward.1
= control target key start
LH: loop header
LB: loop body
LE: loop exit
PB: predicated region body
PF: predicated region fallthrough
CT: control target
= control target key end

     0   :  { %s1368_s30 = smov 0   ;;  %s1370_s10 = smov 0   ;;  %s1529_s0 = inlined_call_operand.vmem [shape: f32[40,5], index: 0, kind: input, shape index: {}]   ;;  %s1530_s1 = inlined_call_operand.vmem [shape: f32[5,20], index: 1, kind: input, shape index: {}]   ;;  %s1531_s2 = inlined_call_operand.vmem [shape: f32[1,20], index: 2, kind: input, shape index: {}]   ;;  %s1532_s3 = inlined_call_operand.vmem [shape: f32[20,20], index: 3, kind: input, shape index: {}]   ;;  %s1533_s4 = inlined_call_operand.vmem [shape: f32[1,20], index: 4, kind: input, shape index: {}]   ;;  %s1534_s5 = inlined_call_operand.vmem [shape: f32[20,20], index: 5, kind: input, shape index: {}]   ;;  %s1535_s6 = inlined_call_operand.vmem [shape: f32[1,20], index: 6, kind: input, shape index: {}]   ;;  %s1536_s7 = inlined_call_operand.vmem [shape: f32[20,8], index: 7, kind: input, shape index: {}]   ;;  %s1537_s8 = inlined_call_operand.vmem [shape: f32[1,8], index: 8, kind: input, shape index: {}]   ;;  %s1538_s9 = inlined_call_operand.vmem [shape: f32[40,8], index: 9, kind: output, shape index: {}]  }
   0x1   :  { %s1372_s11 = smov 0  }
   0x2 LB: > { %s1381_s12 = sadd.s32 4294967295, %s1281_s11   ;;  %s1383_s13 = sadd.s32 1, %s1281_s11   ;;  %s1281_s11 = sphi %s1372_s11, %s1542_s11   ;;  %s1277_s10 = sphi %s1370_s10, %s1541_s10   ;;  %s1273_s30 = sphi %s1368_s30, %s1540_s30  }
   0x3   : > { %s217_s14 = ssub.s32 %s1281_s11, %s1383_s13  ;;  %s220_s15 = sadd.s32 1, %s1277_s10 }
   0x4   : > { %p218_p0 = scmp.eq.s32.totalorder %s217_s14, 0  ;;  %p230_p1 = scmp.ne.s32.totalorder %s1277_s10, %s1273_s30 }
   0x5   : > { %p231_p2 = scmp.eq.s32.totalorder %s1381_s12, 1  ;;  %p1008_p3 = scmp.ge.s32.totalorder %s1281_s11, 1 }
   0x6   : > { %s1391_s16 = scalar_select %p218_p0, %s1277_s10, %s220_s15  }
   0x7   : > { %p1393_p4 = por %p231_p2, %p230_p1  ;;  %p296_p5 = scmp.lt.s32.totalorder %s1281_s11, 3 }
   0x9   : > { %p297_p6 = pnand %p1008_p3, %p296_p5 }
   0xa   : > { %v357_v0 = vld [vmem:[%s1530_s1] sm:$0x1f] (!%p297_p6)  ;;  %vm375_vm0 = vcmask (!%p297_p6), 1044480   ;;  %s1401_s20 = smul.u32 (!%p297_p6), 3, %s1381_s12  ;;  %v1315_v1 = vmov (!%p297_p6), 0.0   ;;  %vm1316_vm1 = vmmov (!%p297_p6), 0  }
   0xb   : > { %300 = sbr.rel (%p297_p6) target bundleno = 955 (0x3bb), region = 56  ;;  %1065 = vmatprep.subr.mxu0 (!%p297_p6), %v1315_v1  ;;  %1067 = vmatprep.mubr.msk.f32.mxu0 (!%p297_p6), %vm1316_vm1, %v1315_v1  ;;  %v1317_v2 = vmov (!%p297_p6), 0.0|0.0   ;;  %vm365_vm2 = vcmask (!%p297_p6), 39936   ;;  %v462_v6 = vld [vmem:[%s1532_s3] sm:$0xff] (!%p297_p6)  ;;  %v463_v7 = vld [vmem:[%s1532_s3 + $0x8] sm:$0xff] (!%p297_p6)  ;;  %vm482_vm3 = vcmask (!%p297_p6), 1043456  }
   0xc   : > { %1066 = vmatpush3.msk.msra.mxu0 (!%p297_p6), %vm375_vm0, %v357_v0  ;;  %p340_p7 = scmp.lt.s32.totalorder (!%p297_p6), %s1401_s20, 4  ;;  %1121 = vmatprep.subr.bf16.mxu1 (!%p297_p6), %v1317_v2  ;;  %v1122_v8 = vpack.c.bf16 (!%p297_p6), %v463_v7, %v462_v6  ;;  %v464_v9 = vld [vmem:[%s1532_s3 + $0x10] sm:$0xf] (!%p297_p6)  ;;  %v569_v10 = vld [vmem:[%s1534_s5] sm:$0xff] (!%p297_p6)  ;;  %v570_v11 = vld [vmem:[%s1534_s5 + $0x8] sm:$0xff] (!%p297_p6)  ;;  %vm472_vm4 = vcmask (!%p297_p6), 162816  }
   0xd   : > { %1082 = vmatprep.mubr.msk.f32.mxu1 (!%p297_p6), %vm1316_vm1, %v1315_v1  ;;  %1124 = vmatprep.subr.bf16.mxu0 (!%p297_p6), %v1317_v2  ;;  %v1125_v12 = vpack.c.bf16 (!%p297_p6), %v570_v11, %v569_v10  ;;  %v571_v13 = vld [vmem:[%s1534_s5 + $0x10] sm:$0xf] (!%p297_p6)  ;;  %v1010_v14 = vld [vmem:[%s1531_s2] ss:$0 sm:$0xff] (!%p297_p6)  ;;  %v675_v28 = vld [vmem:[%s1536_s7 + $0x8] sm:$0xff] (!%p297_p6)  ;;  %vm776_vm5 = vcmask (!%p297_p6), 64512  }
   0xe   : > { %1123 = vmatpush3.bf16.msra.mxu1 (!%p297_p6), %v1122_v8  ;;  %v674_v27 = vld [vmem:[%s1536_s7] sm:$0xff] (!%p297_p6)  ;;  %v676_v30 = vld [vmem:[%s1536_s7 + $0x10] sm:$0xf] (!%p297_p6) }
   0xf   : > { %1080 = vmatprep.subr.mxu1 (!%p297_p6), %v1315_v1  ;;  %v1128_v29 = vpack.c.bf16 (!%p297_p6), %v675_v28, %v674_v27  ;;  %v1015_v31 = vld [vmem:[%s1533_s4] ss:$0 sm:$0xff] (!%p297_p6) }
  0x10   : > { %v1020_v44 = vld [vmem:[%s1535_s6] ss:$0 sm:$0xff] (!%p297_p6) }
  0x11   : > { %v1025_v57 = vld [vmem:[%s1537_s8] ss:$0 sm:$0xff] (!%p297_p6) }
  0x12   : > { %s341_s21 = scalar_select %p340_p7, %s1401_s20, 4  ;;  %1081 = vmatpush3.msk.msra.mxu1 %vm482_vm3, %v464_v9 }
  0x13   : > { %1127 = vmatprep.subr.bf16.mxu1 %v1317_v2  ;;  %s1042_s27 = smul.u32 (%p1393_p4), 24, %s1381_s12 }
  0x14   : > { %s1009_s22 = sshll.u32 %s341_s21, 3 }
  0x15   : > { %s343_s25 = scalar_lea.vmem %s1529_s0, %s1009_s22  ;;  %s332_s22 = sand.u32 1, %s1273_s30  }
  0x16   : > { %v354_v3 = vld [vmem:[%s343_s25] sm:$0xff]  ;;  %v355_v4 = vld [vmem:[%s343_s25 + $0x8] sm:$0xff]  ;;  %v356_v5 = vld [vmem:[%s343_s25 + $0x10] sm:$0xff]  ;;  %s1130_s23 = smul.u32 24, %s332_s22  ;;  %s788_s30 = ssub.s32 (%p1393_p4), 5, %s1401_s20 }
  0x17   : > { %1068 = vmatmul.mubr.msk.f32.vlgmr.msra.gmra.mrb[0].mxu0 %vm365_vm2, %v354_v3  ;;  %p789_p8 = scmp.lt.s32.totalorder (%p1393_p4), %s788_s30, 3  ;;  %s1500_s11 = scalar_lea.vmem (%p1393_p4), %s1538_s9, %s1042_s27  }
  0x18   : > { %1070 = vmatprep.mubr.msk.f32.mxu0 %vm1316_vm1, %v1315_v1  ;;  %1126 = vmatpush3.bf16.msra.mxu0 %v1125_v12  ;;  %s1488_s26 = scalar_lea.vmem [#allocation2], %s1130_s23  }
  0x19   : > { %1095 = vmatprep.subr.mxu0 %v1315_v1 }
  0x1b   : > { %1071 = vmatmul.mubr.msk.f32.gmra.mrb[2].mxu0 %vm365_vm2, %v355_v4 }
  0x1c   : > { %1073 = vmatprep.mubr.msk.f32.mxu0 %vm1316_vm1, %v1315_v1  ;;  %1096 = vmatpush3.msk.msra.mxu0 %vm482_vm3, %v571_v13 }
  0x1f   : > { %1074 = vmatmul.mubr.msk.f32.gmra.mrb[4].mxu0 %vm365_vm2, %v356_v5 }
  0x20   : > { %1097 = vmatprep.mubr.msk.f32.mxu0 %vm1316_vm1, %v1315_v1 }
  0xea   : > { %v445_v15 = vpop.f32.mrb[0].mxu0 }
  0xeb   : > { %v446_v16 = vadd.f32 %v1010_v14, %v445_v15  ;;  %v1069_v17 = vpop.f32.mrb[1].mxu0 }
  0xed   : > { %v459_v18 = vmax.f32 %v446_v16, 0.0 }
  0xee   : > { %v450_v19 = vpop.f32.mrb[2].mxu0 }
  0xef   : > { %v451_v20 = vadd.f32 %v1010_v14, %v450_v19  ;;  %v1072_v21 = vpop.f32.mrb[3].mxu0  ;;  %1083 = vmatmul.mubr.msk.f32.vlgmr.msra.gmra.mrb[0].mxu1 %vm472_vm4, %v459_v18 }
  0xf0   : > { %1085 = vmatprep.mubr.msk.f32.mxu1 %vm1316_vm1, %v1315_v1  ;;  %1129 = vmatpush3.bf16.msra.mxu1 %v1128_v29 }
  0xf1   : > { %v460_v22 = vmax.f32 %v451_v20, 0.0  ;;  %1110 = vmatprep.subr.mxu1 %v1315_v1 }
  0xf2   : > { %v455_v23 = vpop.f32.mrb[4].mxu0 }
  0xf3   : > { %v456_v24 = vadd.f32 %v1010_v14, %v455_v23  ;;  %v1075_v25 = vpop.f32.mrb[5].mxu0  ;;  %1086 = vmatmul.mubr.msk.f32.gmra.mrb[2].mxu1 %vm472_vm4, %v460_v22 }
  0xf4   : > { %1088 = vmatprep.mubr.msk.f32.mxu1 %vm1316_vm1, %v1315_v1  ;;  %1111 = vmatpush3.msk.msra.mxu1 %vm482_vm3, %v676_v30 }
  0xf5   : > { %v461_v26 = vmax.f32 %v456_v24, 0.0 }
  0xf7   : > { %1089 = vmatmul.mubr.msk.f32.gmra.mrb[4].mxu1 %vm472_vm4, %v461_v26 }
  0xf8   : > { %1112 = vmatprep.mubr.msk.f32.mxu1 %vm1316_vm1, %v1315_v1 }
 0x1c2   : > { %v552_v32 = vpop.f32.mrb[0].mxu1 }
 0x1c3   : > { %v553_v33 = vadd.f32 %v1015_v31, %v552_v32  ;;  %v1084_v34 = vpop.f32.mrb[1].mxu1 }
 0x1c5   : > { %v566_v35 = vmax.f32 %v553_v33, 0.0 }
 0x1c6   : > { %v557_v36 = vpop.f32.mrb[2].mxu1 }
 0x1c7   : > { %v558_v37 = vadd.f32 %v1015_v31, %v557_v36  ;;  %v1087_v38 = vpop.f32.mrb[3].mxu1  ;;  %1098 = vmatmul.mubr.msk.f32.vlgmr.msra.gmra.mrb[6].mxu0 %vm472_vm4, %v566_v35 }
 0x1c8   : > { %1100 = vmatprep.mubr.msk.f32.mxu0 %vm1316_vm1, %v1315_v1 }
 0x1c9   : > { %v567_v39 = vmax.f32 %v558_v37, 0.0 }
 0x1ca   : > { %v562_v40 = vpop.f32.mrb[4].mxu1 }
 0x1cb   : > { %v563_v41 = vadd.f32 %v1015_v31, %v562_v40  ;;  %v1090_v42 = vpop.f32.mrb[5].mxu1  ;;  %1101 = vmatmul.mubr.msk.f32.gmra.mrb[8].mxu0 %vm472_vm4, %v567_v39 }
 0x1cc   : > { %1103 = vmatprep.mubr.msk.f32.mxu0 %vm1316_vm1, %v1315_v1 }
 0x1cd   : > { %v568_v43 = vmax.f32 %v563_v41, 0.0 }
 0x1cf   : > { %1104 = vmatmul.mubr.msk.f32.gmra.mrb[10].mxu0 %vm472_vm4, %v568_v43 }
 0x29a   : > { %v657_v45 = vpop.f32.mrb[6].mxu0 }
 0x29b   : > { %v658_v46 = vadd.f32 %v1020_v44, %v657_v45  ;;  %v1099_v47 = vpop.f32.mrb[7].mxu0 }
 0x29d   : > { %v671_v48 = vmax.f32 %v658_v46, 0.0 }
 0x29e   : > { %v662_v49 = vpop.f32.mrb[8].mxu0 }
 0x29f   : > { %v663_v50 = vadd.f32 %v1020_v44, %v662_v49  ;;  %v1102_v51 = vpop.f32.mrb[9].mxu0  ;;  %1113 = vmatmul.mubr.msk.f32.vlgmr.msra.gmra.mrb[6].mxu1 %vm472_vm4, %v671_v48 }
 0x2a0   : > { %1115 = vmatprep.mubr.msk.f32.mxu1 %vm1316_vm1, %v1315_v1 }
 0x2a1   : > { %v672_v52 = vmax.f32 %v663_v50, 0.0 }
 0x2a2   : > { %v667_v53 = vpop.f32.mrb[10].mxu0 }
 0x2a3   : > { %v668_v54 = vadd.f32 %v1020_v44, %v667_v53  ;;  %v1105_v55 = vpop.f32.mrb[11].mxu0  ;;  %1116 = vmatmul.mubr.msk.f32.gmra.mrb[8].mxu1 %vm472_vm4, %v672_v52 }
 0x2a4   : > { %1118 = vmatprep.mubr.msk.f32.mxu1 %vm1316_vm1, %v1315_v1 }
 0x2a5   : > { %v673_v56 = vmax.f32 %v668_v54, 0.0 }
 0x2a7   : > { %1119 = vmatmul.mubr.msk.f32.gmra.mrb[10].mxu1 %vm472_vm4, %v673_v56 }
 0x372   : > { %v762_v58 = vpop.f32.mrb[6].mxu1 }
 0x373   : > { %v763_v59 = vadd.f32 %v1025_v57, %v762_v58  ;;  %v1114_v60 = vpop.f32.mrb[7].mxu1 }
 0x375   : > { %777 = vst.msk [vmem:[%s1488_s26] sm:$0xff] %vm776_vm5, %v763_v59 }
 0x376   : > { %v767_v61 = vpop.f32.mrb[8].mxu1 }
 0x377   : > { %v768_v62 = vadd.f32 %v1025_v57, %v767_v61  ;;  %v1117_v63 = vpop.f32.mrb[9].mxu1  ;;  %786 = sbr.rel (!%p1393_p4) target bundleno = 955 (0x3bb), region = 60 }
 0x379   : > { %778 = vst.msk [vmem:[%s1488_s26 + $0x8] sm:$0xff] %vm776_vm5, %v768_v62 }
 0x37a   : > { %v772_v0 = vpop.f32.mrb[10].mxu1 }
 0x37b   : > { %v773_v1 = vadd.f32 %v1025_v57, %v772_v0  ;;  %v1120_v2 = vpop.f32.mrb[11].mxu1 }
 0x37d   : > { %779 = vst.msk [vmem:[%s1488_s26 + $0x10] sm:$0xff] %vm776_vm5, %v773_v1 }
 0x37e   : > { %s1544_s30 = smov (!%p789_p8, %s788_s30), 3 }
 0x37f   : > { %s1030_s14 = sshll.u32 %s1544_s30, 7 }
 0x380   : > { %p1033_p9 = scmp.eq.s32.totalorder %s1030_s14, 0 }
 0x381   : > { %1223 = sdivrem.u32 (!%p1033_p9), %s1544_s30, 3 }
 0x382   : > { %797 = sbr.rel (%p1033_p9) target bundleno = 955 (0x3bb), region = 64 }
 0x38a   : > { %s1506_s17 = spop.drf %1223 }
 0x38b   : > { %p1034_p10 = scmp.le.s32.totalorder %s1506_s17, 0 }
 0x38c   : > { %s1283_s12 = smov (!%p1034_p10), %s1500_s11   ;;  %s1287_s20 = smov (!%p1034_p10), %s1488_s26  }
 0x38d   : > { %961 = sbr.rel (%p1034_p10) target bundleno = 926 (0x39e), region = 140  ;;  %s1291_s15 = smov (!%p1034_p10), 0  }
 0x38e   : > { %s1295_s18 = smov (!%p1034_p10), 0  }
 0x394 LB: >> { %v865_v3 = vld [vmem:[%s1289_s20] sm:$0xff]  ;;  %v867_v4 = vld [vmem:[%s1289_s20 + $0x8] sm:$0xff]  ;;  %v869_v5 = vld [vmem:[%s1289_s20 + $0x10] sm:$0xff]  ;;  %s871_s19 = sadd.s32 1, %s1293_s15  ;;  %s859_s18 = sadd.s32 1, %s1297_s18   ;;  %s1297_s18 = sphi %s1295_s18, %s859_s18   ;;  %s1293_s15 = sphi %s1291_s15, %s1292_s15   ;;  %s1289_s20 = sphi %s1287_s20, %s876_s20   ;;  %s1285_s12 = sphi %s1283_s12, %s877_s12  }
 0x395   : >> { %866 = vst [vmem:[%s1285_s12] sm:$0xff] %v865_v3  ;;  %868 = vst [vmem:[%s1285_s12 + $0x8] sm:$0xff] %v867_v4  ;;  %p872_p11 = scmp.ge.s32.totalorder %s871_s19, %s1506_s17  ;;  %p858_p12 = scmp.ge.s32.totalorder %s859_s18, %s1506_s17 }
 0x396   : >> { %870 = vst [vmem:[%s1285_s12 + $0x10] sm:$0xff] %v869_v5 }
 0x397   : >> { %s1546_s19 = smov (%p872_p11, %s871_s19), 0  ;;  %861 = sbr.rel (!%p858_p12) target bundleno = 916 (0x394), region = 146 }
 0x398   : >> { %s874_s21 = smul.u32 24, %s1546_s19  ;;  %s1292_s15 = smov %s1546_s19  }
 0x39a   : >> { %s876_s20 = scalar_lea.vmem %s1488_s26, %s874_s21 [#allocation2]   ;;  %s877_s12 = scalar_lea.vmem %s1500_s11, %s874_s21  }
 0x39e PF: > { %1225 = sdivrem.u32 %s1544_s30, 3 }
 0x39f   : > { %s1035_s22 = smul.u32 24, %s1506_s17 }
 0x3a1   : > { %s882_s23 = scalar_lea.vmem %s1488_s26, %s1035_s22 [#allocation2]   ;;  %s884_s24 = scalar_lea.vmem %s1500_s11, %s1035_s22  }
 0x3a7   : > { %s1226_s25 = spop.drf %1225 }
 0x3a8   : > { %p1037_p13 = scmp.le.s32.totalorder %s1226_s25, 0 }
 0x3a9   : > { %s1299_s27 = smov (!%p1037_p13), %s884_s24   ;;  %s1303_s28 = smov (!%p1037_p13), %s882_s23  }
 0x3aa   : > { %975 = sbr.rel (%p1037_p13) target bundleno = 955 (0x3bb), region = 151  ;;  %s1307_s29 = smov (!%p1037_p13), 0  }
 0x3ab   : > { %s1311_s14 = smov (!%p1037_p13), 0  }
 0x3b1 LB: >> { %v894_v6 = vld [vmem:[%s1305_s28] sm:$0xff]  ;;  %s896_s12 = sadd.s32 1, %s1309_s29  ;;  %s888_s14 = sadd.s32 1, %s1313_s14   ;;  %s1313_s14 = sphi %s1311_s14, %s888_s14   ;;  %s1309_s29 = sphi %s1307_s29, %s1308_s29   ;;  %s1305_s28 = sphi %s1303_s28, %s901_s28   ;;  %s1301_s27 = sphi %s1299_s27, %s902_s27  }
 0x3b2   : >> { %895 = vst [vmem:[%s1301_s27] sm:$0xff] %v894_v6  ;;  %p897_p0 = scmp.ge.s32.totalorder %s896_s12, %s1226_s25  ;;  %p887_p1 = scmp.ge.s32.totalorder %s888_s14, %s1226_s25 }
 0x3b4   : >> { %s1548_s12 = smov (%p897_p0, %s896_s12), 0  ;;  %890 = sbr.rel (!%p887_p1) target bundleno = 945 (0x3b1), region = 157 }
 0x3b5   : >> { %s1038_s26 = sshll.u32 %s1548_s12, 3  ;;  %s1308_s29 = smov %s1548_s12  }
 0x3b6   : >> { %s901_s28 = scalar_lea.vmem %s882_s23, %s1038_s26 [#allocation2]   ;;  %s902_s27 = scalar_lea.vmem %s884_s24, %s1038_s26  }
 0x3bb PF: > { %p16_p2 = scmp.ge.s32.totalorder %s1383_s13, 4   ;;  %s1540_s30 = smov %s1277_s10 }
 0x3bc   : > { %s1541_s10 = smov %s1391_s16  ;;  %s1542_s11 = smov %s1383_s13 }
 0x3bd   :  { %18 = sbr.rel (!%p16_p2) target bundleno = 2 (0x2), region = 168 }

</bundles_post_ra>
